<compile_context>
chip_gen: v7x
topology: tpu7x:2x2x1
jax: 0.10.0
libtpu: 0.0.40
codegen_flags: <defaults>
</compile_context>

<pallas_src>
import numpy as np
import jax
import jax.numpy as jnp
from jax import lax
from jax.experimental import pallas as pl
from jax.experimental.pallas import tpu as pltpu


def _round_up(v, m):
    return ((v + m - 1) // m) * m


# ----------------------------------------------------------------------------
# Kernel
# ----------------------------------------------------------------------------
def make_ensemble_kernel(row_offsets, in_dims, out_pads, n_layers):
    """refs = (x, w_packed, b_packed, out)

    x:        (B, n_input)                f32
    w_packed: (R_total, C_max)            f32  -- per-layer weights stacked along rows
    b_packed: (n_layers, C_max)           f32  -- per-layer biases (zero padded)
    out:      (B, out_pads[-1])           f32  -- lane-dense padded output tile
    """
    def kernel(x_ref, w_ref, b_ref, out_ref):
        h = x_ref[...].astype(jnp.float32)                       # (B, n_input)

        for i in range(n_layers):                                # fully unrolled (static)
            r0, k, n = row_offsets[i], in_dims[i], out_pads[i]
            w = w_ref[r0:r0 + k, 0:n]                            # static, tile-aligned slice
            b = b_ref[i:i + 1, 0:n]                              # (1, n)
            h = jnp.dot(h, w, preferred_element_type=jnp.float32) + b
            if i < n_layers - 1:
                h = jnp.maximum(h, 0.2 * h)                      # LeakyReLU(0.2): vmul+vmax

        # Epilogue: lanes are model-major pairs [mu_m, raw_sigma_m, ...].
        # Even lane -> identity (mu); odd lane -> softplus (threshold 20, clamped exp).
        col = lax.broadcasted_iota(jnp.int32, h.shape, dimension=1)
        sp = jnp.where(h > 20.0, h, jnp.log1p(jnp.exp(jnp.minimum(h, 20.0))))
        out_ref[...] = jnp.where((col % 2) == 0, h, sp).astype(out_ref.dtype)

    return kernel


# ----------------------------------------------------------------------------
# Parameter packing (wrapper side, done once)
# ----------------------------------------------------------------------------
def pack_ensemble_params(params, n_input, n_models):
    """params: list over layers (hidden..., tail) of (W, b) with
         W: (M, d_in, d_out), b: (M, 1, d_out).
    Returns (w_buf, b_buf, meta):
      w_buf: (R_total, C_max) f32.  Layer 0 is the lane-folded weight
             (n_input, M*d0); layers >= 1 are zero-padded block-diagonal
             (P_{i-1}, P_i) stacked weights.  Row blocks are 8-aligned,
             column widths 128-aligned.
      b_buf: (n_layers, C_max) f32, model-major, zero padded.
    """
    n_layers = len(params)
    out_dims = [int(w.shape[2]) for (w, _) in params]
    P = [_round_up(n_models * d, 128) for d in out_dims]     # padded activation widths
    C = max(P)

    in_dims = [n_input] + P[:-1]                             # kernel contraction sizes
    row_blk = [_round_up(n_input, 8)] + P[:-1]               # rows reserved per layer
    offsets = [0]
    for rb in row_blk[:-1]:
        offsets.append(offsets[-1] + rb)
    R = sum(row_blk)

    w_buf = np.zeros((R, C), np.float32)
    b_buf = np.zeros((n_layers, C), np.float32)

    # Layer 0: fold ensemble into lanes  (M, n_in, d0) -> (n_in, M*d0)
    w0 = np.asarray(params[0][0], np.float32)
    d0 = out_dims[0]
    w_buf[offsets[0]:offsets[0] + n_input, :n_models * d0] = \
        np.transpose(w0, (1, 0, 2)).reshape(n_input, n_models * d0)
    b_buf[0, :n_models * d0] = np.asarray(params[0][1], np.float32).reshape(-1)

    # Layers 1..L-1 (incl. tail): block-diagonal stacked weights
    for i in range(1, n_layers):
        wi = np.asarray(params[i][0], np.float32)            # (M, d_in, d_out)
        bi = np.asarray(params[i][1], np.float32).reshape(n_models, out_dims[i])
        d_in, d_out = int(wi.shape[1]), int(wi.shape[2])
        r0 = offsets[i]
        for m in range(n_models):
            w_buf[r0 + m * d_in: r0 + (m + 1) * d_in,
                  m * d_out: (m + 1) * d_out] = wi[m]
            b_buf[i, m * d_out: (m + 1) * d_out] = bi[m]

    meta = dict(offsets=offsets, in_dims=in_dims, out_pads=P,
                n_layers=n_layers, col_max=C)
    return jnp.asarray(w_buf), jnp.asarray(b_buf), meta


# ----------------------------------------------------------------------------
# Wrapper
# ----------------------------------------------------------------------------
def deep_ensemble_forward(x, params):
    """
    x:      (batch, n_input) float32
    params: list over layers of (W_stacked, b_stacked),
            W: (n_models, d_in, d_out), b: (n_models, 1, d_out)
    returns (n_models * batch, 2) float32 (members concatenated along axis 0,
            identical to torch.cat(fin_output, dim=0)).
    """
    batch, n_input = x.shape
    n_models = int(params[0][0].shape[0])

    w_buf, b_buf, meta = pack_ensemble_params(params, n_input, n_models)
    kernel = make_ensemble_kernel(meta["offsets"], meta["in_dims"],
                                  meta["out_pads"], meta["n_layers"])
    out_w = meta["out_pads"][-1]

    flops = int(2 * batch * sum(k * n for k, n in zip(meta["in_dims"], meta["out_pads"])))
    transcendentals = int(2 * batch * out_w)                 # exp + log1p in epilogue
    bytes_accessed = int(4 * (x.size + w_buf.size + b_buf.size + batch * out_w))

    out_padded = pl.pallas_call(
        kernel,
        out_shape=jax.ShapeDtypeStruct((batch, out_w), jnp.float32),
        in_specs=[pl.BlockSpec(memory_space=pltpu.MemorySpace.VMEM)] * 3,
        out_specs=pl.BlockSpec(memory_space=pltpu.MemorySpace.VMEM),
        cost_estimate=pl.CostEstimate(flops=flops,
                                      transcendentals=transcendentals,
                                      bytes_accessed=bytes_accessed),
    )(x.astype(jnp.float32), w_buf, b_buf)

    # Lanes are model-major [mu_0, sig_0, mu_1, sig_1, ...]; strip padding and
    # reorder to torch.cat(..., dim=0) layout.
    out = out_padded[:, :n_models * 2].reshape(batch, n_models, 2)
    return jnp.transpose(out, (1, 0, 2)).reshape(n_models * batch, 2)


# ----------------------------------------------------------------------------
# Deterministic synthetic params + pure-JAX reference
# ----------------------------------------------------------------------------
def init_params(key, n_input, hidden_layers, n_models, n_output=2):
    params = []
    dims = [n_input] + list(hidden_layers) + [n_output]
    for i in range(len(dims) - 1):
        d_in, d_out = dims[i], dims[i + 1]
        key, kw, kb = jax.random.split(key, 3)
        w = jax.random.normal(kw, (n_models, d_in, d_out), jnp.float32) * 0.1
        b = jax.random.normal(kb, (n_models, 1, d_out), jnp.float32) * 0.01
        params.append((w, b))
    return params


def reference_forward(x, params):
    n_models = params[0][0].shape[0]
    outs = []
    for m in range(n_models):
        h = x
        for (w, b) in params[:-1]:
            h = jnp.dot(h, w[m], precision=lax.Precision.HIGHEST) + b[m][0]
            h = jnp.where(h > 0, h, 0.2 * h)
        wt, bt = params[-1]
        t = jnp.dot(h, wt[m], precision=lax.Precision.HIGHEST) + bt[m][0]
        mu = t[:, :1]
        rs = t[:, 1:]
        sigma = jnp.where(rs > 20.0, rs, jnp.log1p(jnp.exp(jnp.minimum(rs, 20.0))))
        outs.append(jnp.concatenate([mu, sigma], axis=1))
    return jnp.concatenate(outs, axis=0)


if __name__ == "__main__":
    key = jax.random.PRNGKey(0)
    batch = 8
    n_input = 16
    hidden_layers = [32, 32]
    n_models = 5

    key, kx = jax.random.split(key)
    x = jax.random.normal(kx, (batch, n_input), jnp.float32)
    params = init_params(key, n_input, hidden_layers, n_models)

    out = jax.block_until_ready(deep_ensemble_forward(x, params))
    ref = reference_forward(x, params)

    assert out.shape == (n_models * batch, 2), out.shape
    assert jnp.allclose(out, ref, atol=2e-3, rtol=2e-3), \
        float(jnp.max(jnp.abs(out - ref)))

    print("KERNEL_OK")
</pallas_src>

<mosaic_0001>
module attributes {stable_mosaic.version = 11 : i64} {
  func.func @kernel(%arg0: memref<8x16xf32, #tpu.memory_space<vmem>>, %arg1: memref<528x256xf32, #tpu.memory_space<vmem>>, %arg2: memref<3x256xf32, #tpu.memory_space<vmem>>, %arg3: memref<8x128xf32, #tpu.memory_space<vmem>>) attributes {dimension_semantics = [], scalar_prefetch = 0 : i64, scratch_operands = 0 : i64, tpu.core_type = #tpu.core_type<tc>} {
    %c0 = arith.constant 0 : index
    %c0_0 = arith.constant 0 : index
    %0 = vector.load %arg0[%c0, %c0_0] : memref<8x16xf32, #tpu.memory_space<vmem>>, vector<8x16xf32>
    %c0_1 = arith.constant 0 : index
    %c0_2 = arith.constant 0 : index
    %1 = vector.load %arg1[%c0_1, %c0_2] : memref<528x256xf32, #tpu.memory_space<vmem>>, vector<16x256xf32>
    %c0_3 = arith.constant 0 : index
    %c0_4 = arith.constant 0 : index
    %2 = vector.load %arg2[%c0_3, %c0_4] : memref<3x256xf32, #tpu.memory_space<vmem>>, vector<1x256xf32>
    %cst = arith.constant dense<0.000000e+00> : vector<8x256xf32>
    %3 = tpu.matmul %0, %1, %cst {dimension_numbers = #tpu.dot_dimension_numbers<[1], [0], [0], [1], [0, 0, 1, 1], [], []>} : vector<8x16xf32>, vector<16x256xf32>, vector<8x256xf32> -> vector<8x256xf32>
    %4 = vector.broadcast %2 : vector<1x256xf32> to vector<8x256xf32>
    %5 = arith.addf %3, %4 : vector<8x256xf32>
    %cst_5 = arith.constant 2.000000e-01 : f32
    %6 = vector.broadcast %cst_5 : f32 to vector<8x256xf32>
    %7 = arith.mulf %6, %5 : vector<8x256xf32>
    %8 = arith.maximumf %5, %7 : vector<8x256xf32>
    %c16 = arith.constant 16 : index
    %c0_6 = arith.constant 0 : index
    %9 = vector.load %arg1[%c16, %c0_6] : memref<528x256xf32, #tpu.memory_space<vmem>>, vector<256x256xf32>
    %c1 = arith.constant 1 : index
    %c0_7 = arith.constant 0 : index
    %10 = vector.load %arg2[%c1, %c0_7] : memref<3x256xf32, #tpu.memory_space<vmem>>, vector<1x256xf32>
    %cst_8 = arith.constant dense<0.000000e+00> : vector<8x256xf32>
    %11 = tpu.matmul %8, %9, %cst_8 {dimension_numbers = #tpu.dot_dimension_numbers<[1], [0], [0], [1], [0, 0, 1, 1], [], []>} : vector<8x256xf32>, vector<256x256xf32>, vector<8x256xf32> -> vector<8x256xf32>
    %12 = vector.broadcast %10 : vector<1x256xf32> to vector<8x256xf32>
    %13 = arith.addf %11, %12 : vector<8x256xf32>
    %cst_9 = arith.constant 2.000000e-01 : f32
    %14 = vector.broadcast %cst_9 : f32 to vector<8x256xf32>
    %15 = arith.mulf %14, %13 : vector<8x256xf32>
    %16 = arith.maximumf %13, %15 : vector<8x256xf32>
    %c272 = arith.constant 272 : index
    %c0_10 = arith.constant 0 : index
    %17 = vector.load %arg1[%c272, %c0_10] : memref<528x256xf32, #tpu.memory_space<vmem>>, vector<256x128xf32>
    %c2 = arith.constant 2 : index
    %c0_11 = arith.constant 0 : index
    %18 = vector.load %arg2[%c2, %c0_11] : memref<3x256xf32, #tpu.memory_space<vmem>>, vector<1x128xf32>
    %cst_12 = arith.constant dense<0.000000e+00> : vector<8x128xf32>
    %19 = tpu.matmul %16, %17, %cst_12 {dimension_numbers = #tpu.dot_dimension_numbers<[1], [0], [0], [1], [0, 0, 1, 1], [], []>} : vector<8x256xf32>, vector<256x128xf32>, vector<8x128xf32> -> vector<8x128xf32>
    %20 = vector.broadcast %18 : vector<1x128xf32> to vector<8x128xf32>
    %21 = arith.addf %19, %20 : vector<8x128xf32>
    %22 = tpu.iota {dimensions = array<i32: 1>} : vector<8x128xi32>
    %cst_13 = arith.constant 2.000000e+01 : f32
    %23 = vector.broadcast %cst_13 : f32 to vector<8x128xf32>
    %24 = arith.cmpf ogt, %21, %23 : vector<8x128xf32>
    %cst_14 = arith.constant 2.000000e+01 : f32
    %25 = vector.broadcast %cst_14 : f32 to vector<8x128xf32>
    %26 = arith.minimumf %21, %25 : vector<8x128xf32>
    %27 = math.exp %26 : vector<8x128xf32>
    %28 = math.log1p %27 : vector<8x128xf32>
    %29 = arith.select %24, %21, %28 : vector<8x128xi1>, vector<8x128xf32>
    %c2_i32 = arith.constant 2 : i32
    %c0_i32 = arith.constant 0 : i32
    %30 = arith.cmpi eq, %c2_i32, %c0_i32 : i32
    %c1_i32 = arith.constant 1 : i32
    %31 = arith.select %30, %c1_i32, %c2_i32 : i32
    %32 = vector.broadcast %31 : i32 to vector<8x128xi32>
    %33 = arith.remsi %22, %32 : vector<8x128xi32>
    %c0_i32_15 = arith.constant 0 : i32
    %34 = vector.broadcast %c0_i32_15 : i32 to vector<8x128xi32>
    %35 = arith.cmpi ne, %33, %34 : vector<8x128xi32>
    %c0_i32_16 = arith.constant 0 : i32
    %36 = vector.broadcast %c0_i32_16 : i32 to vector<8x128xi32>
    %37 = arith.cmpi slt, %33, %36 : vector<8x128xi32>
    %c0_i32_17 = arith.constant 0 : i32
    %38 = arith.cmpi slt, %31, %c0_i32_17 : i32
    %39 = vector.broadcast %38 : i1 to vector<8x128xi1>
    %40 = vector.broadcast %39 : vector<8x128xi1> to vector<8x128xi1>
    %41 = arith.xori %37, %40 : vector<8x128xi1>
    %42 = arith.andi %41, %35 : vector<8x128xi1>
    %43 = vector.broadcast %31 : i32 to vector<8x128xi32>
    %44 = arith.addi %33, %43 : vector<8x128xi32>
    %45 = arith.select %42, %44, %33 : vector<8x128xi1>, vector<8x128xi32>
    %c0_i32_18 = arith.constant 0 : i32
    %46 = vector.broadcast %c0_i32_18 : i32 to vector<8x128xi32>
    %47 = arith.cmpi eq, %45, %46 : vector<8x128xi32>
    %48 = arith.select %47, %21, %29 : vector<8x128xi1>, vector<8x128xf32>
    %c0_19 = arith.constant 0 : index
    %c0_20 = arith.constant 0 : index
    %49 = vector.load %arg3[%c0_19, %c0_20] : memref<8x128xf32, #tpu.memory_space<vmem>>, vector<8x128xf32>
    tpu.vector_store %arg3[%c0_19, %c0_20], %48 {strides = array<i32>} : memref<8x128xf32, #tpu.memory_space<vmem>>, vector<8x128xf32>,
    return
  }
}

</mosaic_0001>

<bundles_post_ra>
// kernel: tpu_custom_call.1
= control target key start
LH: loop header
LB: loop body
LE: loop exit
PB: predicated region body
PF: predicated region fallthrough
CT: control target
= control target key end

     0   :  { %8 = vsyncpa [#allocation3], 0  ;;  %s771_s0 = inlined_call_operand.hbm [shape: f32[8,16], index: 0, kind: input, shape index: {}]   ;;  %s772_s1 = inlined_call_operand.hbm [shape: f32[528,256], index: 1, kind: input, shape index: {}]   ;;  %s773_s2 = inlined_call_operand.hbm [shape: f32[3,256], index: 2, kind: input, shape index: {}]   ;;  %s774_s3 = inlined_call_operand.hbm [shape: f32[8,128], index: 3, kind: output, shape index: {}]  }
   0x1   :  { %9 = vsyncpa [#allocation6], 0 }
   0x2   :  { %10 = vsyncpa [#allocation4], 0  ;;  %s696_s12 = smov [#allocation5]   ;;  %s602_s16 = scalar_lea.hbm %s772_s1, 16896 }
   0x3   :  { %s26_s13 = sshll.u32 %s696_s12, 4  ;;  %p603_p0 = scmp.ne.s32.totalorder %s772_s1, %s602_s16  ;;  %s27_s13 = int_to_ptr.vmem [resolvable:$true] %s26_s13 }
   0x4   :  { %p606_p1 = scmp.lt.u32.totalorder %s602_s16, %s772_s1 }
   0x6   :  { %p608_p2 = pnand %p606_p1, %p603_p0 }
   0x8   :  { %611 = shalt.err (!%p608_p2)
}
   0x9   :  { %s612_s21 = scalar_lea.vmem %s27_s13, 16896  ;;  %p617_p4 = scmp.lt.s32.totalorder %s27_s13, %s27_s13 }
   0xa   :  { %p613_p3 = scmp.ne.s32.totalorder %s27_s13, %s612_s21  ;;  %p618_p5 = scmp.lt.s32.totalorder %s612_s21, %s612_s21 }
   0xc   :  { %p619_p6 = por %p618_p5, %p617_p4 }
   0xe   :  { %p620_p7 = pnand %p619_p6, %p613_p3 }
  0x10   :  { %623 = shalt.err (!%p620_p7)
}
  0x11   :  { %s697_s22 = smov 256   ;;  %s698_s23 = smov 16  }
  0x12   :  { %32 = dma.hbm_to_vmem [thread:$0]  %s772_s1, 16896, %s27_s13, [#allocation6], %s697_s22, %s697_s22, %s698_s23  }
  0x13   :  { %s699_s26 = smov [#allocation2]   ;;  %s700_s28 = smov [#allocation7]  }
  0x14   :  { %s17_s27 = sshll.u32 %s699_s26, 4  ;;  %s39_s29 = sshll.u32 %s700_s28, 4  ;;  %s18_s27 = int_to_ptr.vmem [resolvable:$true] %s17_s27  ;;  %s40_s29 = int_to_ptr.vmem [resolvable:$true] %s39_s29 }
  0x15   :  { %s624_s5 = scalar_lea.hbm %s771_s0, 128 }
  0x16   :  { %p625_p8 = scmp.ne.s32.totalorder %s771_s0, %s624_s5  ;;  %p628_p9 = scmp.lt.u32.totalorder %s624_s5, %s771_s0 }
  0x18   :  { %p630_p10 = pnand %p628_p9, %p625_p8 }
  0x1a   :  { %633 = shalt.err (!%p630_p10)
}
  0x1b   :  { %s634_s1 = scalar_lea.vmem %s18_s27, 128  ;;  %p639_p12 = scmp.lt.s32.totalorder %s18_s27, %s18_s27 }
  0x1c   :  { %p635_p11 = scmp.ne.s32.totalorder %s18_s27, %s634_s1  ;;  %p640_p13 = scmp.lt.s32.totalorder %s634_s1, %s634_s1 }
  0x1e   :  { %p641_p0 = por %p640_p13, %p639_p12 }
  0x20   :  { %p642_p1 = pnand %p641_p0, %p635_p11 }
  0x22   :  { %645 = shalt.err (!%p642_p1)
}
  0x23   :  { %20 = dma.hbm_to_vmem [thread:$0]  %s771_s0, 128, %s18_s27, [#allocation3]  }
  0x24   :  { %s646_s14 = scalar_lea.hbm %s773_s2, 128 }
  0x25   :  { %p647_p2 = scmp.ne.s32.totalorder %s773_s2, %s646_s14  ;;  %p650_p3 = scmp.lt.u32.totalorder %s646_s14, %s773_s2 }
  0x27   :  { %p652_p4 = pnand %p650_p3, %p647_p2 }
  0x29   :  { %655 = shalt.err (!%p652_p4)
}
  0x2a   :  { %s656_s19 = scalar_lea.vmem %s40_s29, 128  ;;  %p661_p6 = scmp.lt.s32.totalorder %s40_s29, %s40_s29 }
  0x2b   :  { %p657_p5 = scmp.ne.s32.totalorder %s40_s29, %s656_s19  ;;  %p662_p7 = scmp.lt.s32.totalorder %s656_s19, %s656_s19 }
  0x2d   :  { %p663_p8 = por %p662_p7, %p661_p6 }
  0x2f   :  { %p664_p9 = pnand %p663_p8, %p657_p5 }
  0x31   :  { %667 = shalt.err (!%p664_p9)
}
  0x32   :  { %42 = dma.hbm_to_vmem [thread:$0]  %s773_s2, 128, %s40_s29, [#allocation6]  }
  0x33   :  { %690 = dma.done.wait [#allocation3], 128  }
  0x34   :  { %691 = vsyncadd [#allocation3], 4294967168 }
  0x35   :  { %692 = dma.done.wait [#allocation6], 17024  }
  0x36   :  { %693 = vsyncadd [#allocation6], 4294950272  ;;  %v701_v0 = vmov 0.0   ;;  %v54_v1 = vld [vmem:[#allocation5 + $0x8] sm:$0xff]  ;;  %v56_v2 = vld [vmem:[#allocation5 + $0x18] sm:$0xff]  ;;  %vm69_vm0 = vcmask 130048  }
  0x37   :  { %137 = vmatprep.mubr.f32.mxu0 %v701_v0  ;;  %v53_v3 = vld [vmem:[#allocation5] sm:$0xff]  ;;  %v491_v4 = vpack.c.bf16 %v56_v2, %v54_v1  ;;  %v55_v5 = vld [vmem:[#allocation5 + $0x10] sm:$0xff]  ;;  %v149_v6 = vld [vmem:[#allocation5 + $0x28] sm:$0xff]  ;;  %s702_s2 = smov [#allocation8]  }
  0x38   :  { %v493_v7 = vpack.c.bf16 %v55_v5, %v53_v3  ;;  %v52_v8 = vld [vmem:[#allocation2] sm:$0xff]  ;;  %v148_v10 = vld [vmem:[#allocation5 + $0x20] sm:$0xff]  ;;  %v150_v11 = vld [vmem:[#allocation5 + $0x30] sm:$0xff]  ;;  %s444_s21 = sshll.u32 %s702_s2, 4  ;;  %s445_s21 = int_to_ptr.vmem [resolvable:$true] %s444_s21 }
  0x39   :  { %v151_v9 = vld [vmem:[#allocation5 + $0x38] sm:$0xff]  ;;  %492 = vmatprep.subr.bf16.mxu0 %v491_v4  ;;  %v497_v13 = vpack.c.bf16 %v150_v11, %v148_v10  ;;  %v153_v14 = vld [vmem:[#allocation5 + $0x48] sm:$0xff]  ;;  %v152_v16 = vld [vmem:[#allocation5 + $0x40] sm:$0xff]  ;;  %s668_s22 = scalar_lea.vmem %s445_s21, 128  ;;  %p673_p11 = scmp.lt.s32.totalorder %s445_s21, %s445_s21 }
  0x3a   :  { %v495_v12 = vpack.c.bf16 %v151_v9, %v149_v6  ;;  %v155_v15 = vld [vmem:[#allocation5 + $0x58] sm:$0xff]  ;;  %494 = vmatpush1.bf16.msra.mxu0 %v493_v7  ;;  %v154_v18 = vld [vmem:[#allocation5 + $0x50] sm:$0xff]  ;;  %v157_v19 = vld [vmem:[#allocation5 + $0x68] sm:$0xff]  ;;  %p669_p10 = scmp.ne.s32.totalorder %s445_s21, %s668_s22  ;;  %p674_p12 = scmp.lt.s32.totalorder %s668_s22, %s668_s22 }
  0x3b   :  { %v499_v17 = vpack.c.bf16 %v155_v15, %v153_v14  ;;  %v159_v20 = vld [vmem:[#allocation5 + $0x78] sm:$0xff]  ;;  %v501_v21 = vpack.c.bf16 %v154_v18, %v152_v16  ;;  %v156_v23 = vld [vmem:[#allocation5 + $0x60] sm:$0xff]  ;;  %v158_v24 = vld [vmem:[#allocation5 + $0x70] sm:$0xff] }
  0x3c   :  { %496 = vmatprep.subr.bf16.mxu1 %v495_v12  ;;  %v503_v22 = vpack.c.bf16 %v159_v20, %v157_v19  ;;  %v161_v25 = vld [vmem:[#allocation5 + $0x88] sm:$0xff]  ;;  %v163_v26 = vld [vmem:[#allocation5 + $0x98] sm:$0xff]  ;;  %v505_v27 = vpack.c.bf16 %v158_v24, %v156_v23  ;;  %v160_v29 = vld [vmem:[#allocation5 + $0x80] sm:$0xff]  ;;  %p675_p13 = por %p674_p12, %p673_p11 }
  0x3d   :  { %498 = vmatpush1.bf16.msra.mxu1 %v497_v13  ;;  %454 = vmatmul.mubr.msk.f32.vlgmr.msra.gmra.mrb[0].mxu0 %vm69_vm0, %v52_v8  ;;  %v507_v28 = vpack.c.bf16 %v163_v26, %v161_v25  ;;  %v162_v30 = vld [vmem:[#allocation5 + $0x90] sm:$0xff]  ;;  %v165_v31 = vld [vmem:[#allocation5 + $0xa8] sm:$0xff]  ;;  %v167_v32 = vld [vmem:[#allocation5 + $0xb8] sm:$0xff] }
  0x3e   :  { %500 = vmatprep.subr.bf16.mxu1 %v499_v17  ;;  %v509_v33 = vpack.c.bf16 %v162_v30, %v160_v29  ;;  %v511_v34 = vpack.c.bf16 %v167_v32, %v165_v31  ;;  %v164_v35 = vld [vmem:[#allocation5 + $0xa0] sm:$0xff]  ;;  %v166_v36 = vld [vmem:[#allocation5 + $0xb0] sm:$0xff]  ;;  %v169_v37 = vld [vmem:[#allocation5 + $0xc8] sm:$0xff]  ;;  %p676_p0 = pnand %p675_p13, %p669_p10 }
  0x3f   :  { %v171_v38 = vld [vmem:[#allocation5 + $0xd8] sm:$0xff]  ;;  %v513_v39 = vpack.c.bf16 %v166_v36, %v164_v35  ;;  %v168_v41 = vld [vmem:[#allocation5 + $0xc0] sm:$0xff]  ;;  %v170_v42 = vld [vmem:[#allocation5 + $0xd0] sm:$0xff] }
  0x40   :  { %v515_v40 = vpack.c.bf16 %v171_v38, %v169_v37  ;;  %v173_v43 = vld [vmem:[#allocation5 + $0xe8] sm:$0xff]  ;;  %v175_v44 = vld [vmem:[#allocation5 + $0xf8] sm:$0xff]  ;;  %v517_v45 = vpack.c.bf16 %v170_v42, %v168_v41  ;;  %v172_v47 = vld [vmem:[#allocation5 + $0xe0] sm:$0xff] }
  0x41   :  { %502 = vmatpush1.bf16.msra.mxu1 %v501_v21  ;;  %v519_v46 = vpack.c.bf16 %v175_v44, %v173_v43  ;;  %v174_v48 = vld [vmem:[#allocation5 + $0xf0] sm:$0xff]  ;;  %v177_v49 = vld [vmem:[#allocation5 + $0x108] sm:$0xff]  ;;  %v179_v50 = vld [vmem:[#allocation5 + $0x118] sm:$0xff] }
  0x42   :  { %504 = vmatprep.subr.bf16.mxu1 %v503_v22  ;;  %v521_v51 = vpack.c.bf16 %v174_v48, %v172_v47  ;;  %v523_v52 = vpack.c.bf16 %v179_v50, %v177_v49  ;;  %v176_v53 = vld [vmem:[#allocation5 + $0x100] sm:$0xff]  ;;  %v178_v54 = vld [vmem:[#allocation5 + $0x110] sm:$0xff]  ;;  %v181_v55 = vld [vmem:[#allocation5 + $0x128] sm:$0xff] }
  0x43   :  { %v183_v56 = vld [vmem:[#allocation5 + $0x138] sm:$0xff]  ;;  %v525_v57 = vpack.c.bf16 %v178_v54, %v176_v53  ;;  %v180_v59 = vld [vmem:[#allocation5 + $0x120] sm:$0xff]  ;;  %v182_v60 = vld [vmem:[#allocation5 + $0x130] sm:$0xff] }
  0x44   :  { %v527_v58 = vpack.c.bf16 %v183_v56, %v181_v55  ;;  %v185_v61 = vld [vmem:[#allocation5 + $0x148] sm:$0xff]  ;;  %v187_v62 = vld [vmem:[#allocation5 + $0x158] sm:$0xff]  ;;  %v529_v63 = vpack.c.bf16 %v182_v60, %v180_v59  ;;  %v184_v1 = vld [vmem:[#allocation5 + $0x140] sm:$0xff] }
  0x45   :  { %506 = vmatpush1.bf16.msra.mxu1 %v505_v27  ;;  %v531_v0 = vpack.c.bf16 %v187_v62, %v185_v61  ;;  %v186_v2 = vld [vmem:[#allocation5 + $0x150] sm:$0xff]  ;;  %v189_v3 = vld [vmem:[#allocation5 + $0x168] sm:$0xff]  ;;  %v191_v4 = vld [vmem:[#allocation5 + $0x178] sm:$0xff] }
  0x46   :  { %508 = vmatprep.subr.bf16.mxu1 %v507_v28  ;;  %v533_v5 = vpack.c.bf16 %v186_v2, %v184_v1  ;;  %v535_v6 = vpack.c.bf16 %v191_v4, %v189_v3  ;;  %v188_v7 = vld [vmem:[#allocation5 + $0x160] sm:$0xff]  ;;  %v190_v8 = vld [vmem:[#allocation5 + $0x170] sm:$0xff]  ;;  %v193_v9 = vld [vmem:[#allocation5 + $0x188] sm:$0xff] }
  0x47   :  { %v195_v10 = vld [vmem:[#allocation5 + $0x198] sm:$0xff]  ;;  %v537_v11 = vpack.c.bf16 %v190_v8, %v188_v7  ;;  %v192_v13 = vld [vmem:[#allocation5 + $0x180] sm:$0xff]  ;;  %v194_v14 = vld [vmem:[#allocation5 + $0x190] sm:$0xff] }
  0x48   :  { %v539_v12 = vpack.c.bf16 %v195_v10, %v193_v9  ;;  %v197_v15 = vld [vmem:[#allocation5 + $0x1a8] sm:$0xff]  ;;  %v199_v16 = vld [vmem:[#allocation5 + $0x1b8] sm:$0xff]  ;;  %v541_v17 = vpack.c.bf16 %v194_v14, %v192_v13  ;;  %v196_v19 = vld [vmem:[#allocation5 + $0x1a0] sm:$0xff] }
  0x49   :  { %510 = vmatpush1.bf16.msra.mxu1 %v509_v33  ;;  %v543_v18 = vpack.c.bf16 %v199_v16, %v197_v15  ;;  %v198_v20 = vld [vmem:[#allocation5 + $0x1b0] sm:$0xff]  ;;  %v201_v21 = vld [vmem:[#allocation5 + $0x1c8] sm:$0xff]  ;;  %v203_v22 = vld [vmem:[#allocation5 + $0x1d8] sm:$0xff] }
  0x4a   :  { %512 = vmatprep.subr.bf16.mxu1 %v511_v34  ;;  %v545_v23 = vpack.c.bf16 %v198_v20, %v196_v19  ;;  %v547_v24 = vpack.c.bf16 %v203_v22, %v201_v21  ;;  %v200_v25 = vld [vmem:[#allocation5 + $0x1c0] sm:$0xff]  ;;  %v202_v26 = vld [vmem:[#allocation5 + $0x1d0] sm:$0xff]  ;;  %v205_v28 = vld [vmem:[#allocation5 + $0x1e8] sm:$0xff] }
  0x4b   :  { %v549_v27 = vpack.c.bf16 %v202_v26, %v200_v25  ;;  %v207_v29 = vld [vmem:[#allocation5 + $0x1f8] sm:$0xff]  ;;  %v204_v31 = vld [vmem:[#allocation5 + $0x1e0] sm:$0xff]  ;;  %v206_v32 = vld [vmem:[#allocation5 + $0x1f0] sm:$0xff] }
  0x4c   :  { %v551_v30 = vpack.c.bf16 %v207_v29, %v205_v28  ;;  %v553_v33 = vpack.c.bf16 %v206_v32, %v204_v31  ;;  %v209_v34 = vld [vmem:[#allocation5 + $0x208] sm:$0xff]  ;;  %v211_v35 = vld [vmem:[#allocation5 + $0x218] sm:$0xff]  ;;  %v208_v37 = vld [vmem:[#allocation5 + $0x200] sm:$0xff] }
  0x4d   :  { %514 = vmatpush1.bf16.msra.mxu1 %v513_v39  ;;  %v555_v36 = vpack.c.bf16 %v211_v35, %v209_v34  ;;  %v210_v38 = vld [vmem:[#allocation5 + $0x210] sm:$0xff]  ;;  %v300_v42 = vld [vmem:[#allocation5 + $0x220] sm:$0xff] }
  0x4e   :  { %516 = vmatprep.subr.bf16.mxu1 %v515_v40  ;;  %v557_v39 = vpack.c.bf16 %v210_v38, %v208_v37  ;;  %v316_v40 = vld [vmem:[#allocation5 + $0x320] sm:$0xff]  ;;  %v317_v41 = vld [vmem:[#allocation5 + $0x330] sm:$0xff] }
  0x4f   :  { %v559_v43 = vpack.c.bf16 %v317_v41, %v316_v40  ;;  %v301_v44 = vld [vmem:[#allocation5 + $0x230] sm:$0xff]  ;;  %v302_v49 = vld [vmem:[#allocation5 + $0x240] sm:$0xff] }
  0x50   :  { %v561_v47 = vpack.c.bf16 %v301_v44, %v300_v42  ;;  %v303_v50 = vld [vmem:[#allocation5 + $0x250] sm:$0xff]  ;;  %v304_v55 = vld [vmem:[#allocation5 + $0x260] sm:$0xff] }
  0x51   :  { %518 = vmatpush1.bf16.msra.mxu1 %v517_v45  ;;  %v318_v45 = vld [vmem:[#allocation5 + $0x340] sm:$0xff]  ;;  %560 = vmatprep.subr.bf16.mxu0 %v559_v43  ;;  %v565_v53 = vpack.c.bf16 %v303_v50, %v302_v49  ;;  %v305_v56 = vld [vmem:[#allocation5 + $0x270] sm:$0xff] }
  0x52   :  { %520 = vmatprep.subr.bf16.mxu1 %v519_v46  ;;  %v319_v46 = vld [vmem:[#allocation5 + $0x350] sm:$0xff]  ;;  %562 = vmatpush3.bf16.msra.mxu0 %v561_v47  ;;  %v569_v59 = vpack.c.bf16 %v305_v56, %v304_v55  ;;  %v306_v61 = vld [vmem:[#allocation5 + $0x280] sm:$0xff] }
  0x53   :  { %v563_v48 = vpack.c.bf16 %v319_v46, %v318_v45  ;;  %v307_v62 = vld [vmem:[#allocation5 + $0x290] sm:$0xff]  ;;  %v308_v3 = vld [vmem:[#allocation5 + $0x2a0] sm:$0xff] }
  0x54   :  { %v573_v1 = vpack.c.bf16 %v307_v62, %v306_v61  ;;  %v309_v4 = vld [vmem:[#allocation5 + $0x2b0] sm:$0xff]  ;;  %v310_v9 = vld [vmem:[#allocation5 + $0x2c0] sm:$0xff] }
  0x55   :  { %522 = vmatpush1.bf16.msra.mxu1 %v521_v51  ;;  %v320_v51 = vld [vmem:[#allocation5 + $0x360] sm:$0xff]  ;;  %564 = vmatprep.subr.bf16.mxu0 %v563_v48  ;;  %v577_v7 = vpack.c.bf16 %v309_v4, %v308_v3  ;;  %v311_v10 = vld [vmem:[#allocation5 + $0x2d0] sm:$0xff] }
  0x56   :  { %524 = vmatprep.subr.bf16.mxu1 %v523_v52  ;;  %v321_v52 = vld [vmem:[#allocation5 + $0x370] sm:$0xff]  ;;  %566 = vmatpush3.bf16.msra.mxu0 %v565_v53  ;;  %v57_v15 = vld [vmem:[#allocation7] ss:$4 sm:$0x3] }
  0x57   :  { %v567_v54 = vpack.c.bf16 %v321_v52, %v320_v51  ;;  %v329_v28 = vld [vmem:[#allocation5 + $0x3f0] sm:$0xff]  ;;  %v455_v51 = vld [vmem:[#allocation7 + $0x2] ss:$0 sm:$0xff] }
  0x58   :  { %v313_v31 = vld [vmem:[#allocation5 + $0x2f0] sm:$0xff] }
  0x59   :  { %526 = vmatpush1.bf16.msra.mxu1 %v525_v57  ;;  %v322_v57 = vld [vmem:[#allocation5 + $0x380] sm:$0xff]  ;;  %568 = vmatprep.subr.bf16.mxu0 %v567_v54  ;;  %v331_v34 = vld [vmem:[#allocation5 + $0x410] sm:$0xff] }
  0x5a   :  { %528 = vmatprep.subr.bf16.mxu1 %v527_v58  ;;  %v323_v58 = vld [vmem:[#allocation5 + $0x390] sm:$0xff]  ;;  %570 = vmatpush3.bf16.msra.mxu0 %v569_v59 }
  0x5b   :  { %v571_v60 = vpack.c.bf16 %v323_v58, %v322_v57  ;;  %v315_v37 = vld [vmem:[#allocation5 + $0x310] sm:$0xff] }
  0x5d   :  { %530 = vmatpush1.bf16.msra.mxu1 %v529_v63  ;;  %v324_v63 = vld [vmem:[#allocation5 + $0x3a0] sm:$0xff]  ;;  %572 = vmatprep.subr.bf16.mxu0 %v571_v60 }
  0x5e   :  { %532 = vmatprep.subr.bf16.mxu1 %v531_v0  ;;  %v325_v0 = vld [vmem:[#allocation5 + $0x3b0] sm:$0xff]  ;;  %574 = vmatpush3.bf16.msra.mxu0 %v573_v1 }
  0x5f   :  { %v575_v2 = vpack.c.bf16 %v325_v0, %v324_v63 }
  0x61   :  { %534 = vmatpush1.bf16.msra.mxu1 %v533_v5  ;;  %v326_v5 = vld [vmem:[#allocation5 + $0x3c0] sm:$0xff]  ;;  %576 = vmatprep.subr.bf16.mxu0 %v575_v2 }
  0x62   :  { %536 = vmatprep.subr.bf16.mxu1 %v535_v6  ;;  %v327_v6 = vld [vmem:[#allocation5 + $0x3d0] sm:$0xff]  ;;  %578 = vmatpush3.bf16.msra.mxu0 %v577_v7 }
  0x63   :  { %v579_v8 = vpack.c.bf16 %v327_v6, %v326_v5 }
  0x65   :  { %538 = vmatpush1.bf16.msra.mxu1 %v537_v11  ;;  %v581_v11 = vpack.c.bf16 %v311_v10, %v310_v9  ;;  %580 = vmatprep.subr.bf16.mxu0 %v579_v8 }
  0x66   :  { %540 = vmatprep.subr.bf16.mxu1 %v539_v12  ;;  %v59_v12 = vlaneseq }
  0x67   :  { %582 = vmatpush3.bf16.msra.mxu0 %v581_v11 }
  0x68   :  { %v60_v13 = vshrl.u32 %v59_v12, 7  ;;  %v408_v60 = vand.u32 127, %v59_v12 }
  0x69   :  { %542 = vmatpush1.bf16.msra.mxu1 %v541_v17 }
  0x6a   :  { %544 = vmatprep.subr.bf16.mxu1 %v543_v18  ;;  %v61_v14 = vsub.s32 0, %v60_v13  ;;  %v65_v16 = vsub.s32 1, %v60_v13  ;;  %v427_v63 = vand.u32 1, %v408_v60 }
  0x6c   :  { %v62_v17 = vrot.slane %v57_v15, %v61_v14  ;;  %v66_v18 = vrot.slane %v57_v15, %v65_v16  ;;  %vm435_vm2 = vcmp.eq.s32.totalorder %v427_v63, 0 }
  0x6d   :  { %546 = vmatpush1.bf16.msra.mxu1 %v545_v23 }
  0x6e   :  { %548 = vmatprep.subr.bf16.mxu1 %v547_v24 }
  0x71   :  { %550 = vmatpush1.bf16.msra.mxu1 %v549_v27  ;;  %v328_v27 = vld [vmem:[#allocation5 + $0x3e0] sm:$0xff] }
  0x72   :  { %552 = vmatprep.subr.bf16.mxu1 %v551_v30  ;;  %v583_v29 = vpack.c.bf16 %v329_v28, %v328_v27  ;;  %v312_v30 = vld [vmem:[#allocation5 + $0x2e0] sm:$0xff] }
  0x73   :  { %v585_v32 = vpack.c.bf16 %v313_v31, %v312_v30 }
  0x74   :  { %584 = vmatprep.subr.bf16.mxu0 %v583_v29 }
  0x75   :  { %554 = vmatpush1.bf16.msra.mxu1 %v553_v33  ;;  %586 = vmatpush3.bf16.msra.mxu0 %v585_v32  ;;  %v330_v33 = vld [vmem:[#allocation5 + $0x400] sm:$0xff] }
  0x76   :  { %556 = vmatprep.subr.bf16.mxu1 %v555_v36  ;;  %v587_v35 = vpack.c.bf16 %v331_v34, %v330_v33  ;;  %v314_v36 = vld [vmem:[#allocation5 + $0x300] sm:$0xff] }
  0x77   :  { %v589_v38 = vpack.c.bf16 %v315_v37, %v314_v36 }
  0x78   :  { %588 = vmatprep.subr.bf16.mxu0 %v587_v35 }
  0x79   :  { %558 = vmatpush1.bf16.msra.mxu1 %v557_v39  ;;  %590 = vmatpush3.bf16.msra.mxu0 %v589_v38  ;;  %v213_v39 = vld [vmem:[#allocation7 + $0x1] ss:$4 sm:$0x3] }
  0x7a   :  { %v218_v40 = vrot.slane %v213_v39, %v61_v14  ;;  %v222_v41 = vrot.slane %v213_v39, %v65_v16 }
 0x110   :  { %v139_v19 = vpop.f32.mrb[0].mxu0 }
 0x111   :  { %v140_v20 = vadd.f32 %v139_v19, %v62_v17  ;;  %v141_v21 = vpop.f32.mrb[1].mxu0 }
 0x112   :  { %v142_v22 = vadd.f32 %v141_v21, %v66_v18 }
 0x113   :  { %v144_v23 = vmul.f32 0.2, %v140_v20 }
 0x114   :  { %v145_v24 = vmul.f32 0.2, %v142_v22 }
 0x115   :  { %v146_v26 = vmax.f32 %v140_v20, %v144_v23 }
 0x116   :  { %v147_v25 = vmax.f32 %v142_v22, %v145_v24 }
 0x118   :  { %289 = vmatprep.mubr.f32.mxu1 %v147_v25 }
 0x119   :  { %290 = vmatmul.mubr.f32.vlgmr.msra.gmra.mrb[0].mxu1 %v146_v26 }
 0x1ec   :  { %v291_v42 = vpop.f32.mrb[0].mxu1 }
 0x1ed   :  { %v292_v43 = vadd.f32 %v291_v42, %v218_v40  ;;  %v293_v44 = vpop.f32.mrb[1].mxu1 }
 0x1ee   :  { %v294_v45 = vadd.f32 %v293_v44, %v222_v41 }
 0x1ef   :  { %v296_v46 = vmul.f32 0.2, %v292_v43 }
 0x1f0   :  { %v297_v47 = vmul.f32 0.2, %v294_v45 }
 0x1f1   :  { %v298_v49 = vmax.f32 %v292_v43, %v296_v46 }
 0x1f2   :  { %v299_v48 = vmax.f32 %v294_v45, %v297_v47 }
 0x1f4   :  { %401 = vmatprep.mubr.f32.mxu0 %v299_v48 }
 0x1f5   :  { %402 = vmatmul.mubr.f32.vlgmr.msra.gmra.mrb[2].mxu0 %v298_v49 }
 0x2c8   :  { %v488_v50 = vpop.f32.mrb[2].mxu0 }
 0x2c9   :  { %v489_v52 = vpop.f32.mrb[3].mxu0 }
 0x2ca   :  { %v490_v53 = vadd.f32 %v489_v52, %v488_v50 }
 0x2cc   :  { %v404_v54 = vadd.f32 %v490_v53, %v455_v51 }
 0x2ce   :  { %v410_v55 = vmin.f32 %v404_v54, 20.0  ;;  %vm409_vm3 = vcmp.gt.f32.partialorder %v404_v54, 20.0 }
 0x2d0   :  { %v411_v56 = vmul.f32 1.442695, %v410_v55 }
 0x2d2   :  { %598 = vpow2.f32 %v411_v56 }
 0x2dc   :  { %v599_v57 = vpop.eup %598 }
 0x2dd   :  { %v413_v58 = vadd.f32 1.0, %v599_v57  ;;  %v416_v59 = vmul.f32 -0.5, %v599_v57  ;;  %v419_v62 = vand.u32 2147483647, %v599_v57 }
 0x2df   :  { %600 = vlog2.f32 %v413_v58  ;;  %v417_v61 = vadd.f32 1.0, %v416_v59  ;;  %vm420_vm1 = vcmp.lt.f32.partialorder %v419_v62, 0.0004427343 }
 0x2e1   :  { %v418_v2 = vmul.f32 %v599_v57, %v417_v61 }
 0x2e9   :  { %v601_v0 = vpop.eup %600 }
 0x2ea   :  { %v415_v1 = vmul.f32 0.6931472, %v601_v0 }
 0x2ec   :  { %v421_v3 = vsel %vm420_vm1, %v418_v2, %v415_v1 }
 0x2ed   :  { %v422_v4 = vsel %vm409_vm3, %v404_v54, %v421_v3 }
 0x2ee   :  { %v436_v5 = vsel %vm435_vm2, %v404_v54, %v422_v4 }
 0x2ef   :  { %437 = vst [vmem:[#allocation8] sm:$0xff] %v436_v5 }
 0x2f0   :  { %679 = shalt.err (!%p676_p0)
}
 0x2f1   :  { %s680_s25 = scalar_lea.hbm %s774_s3, 128 }
 0x2f2   :  { %p681_p1 = scmp.ne.s32.totalorder %s774_s3, %s680_s25  ;;  %p684_p2 = scmp.lt.u32.totalorder %s680_s25, %s774_s3 }
 0x2f4   :  { %p686_p3 = pnand %p684_p2, %p681_p1 }
 0x2f6   :  { %689 = shalt.err (!%p686_p3)
}
 0x2f7   :  { %447 = dma.vmem_to_hbm [thread:$0]  %s445_s21, 128, %s774_s3, [#allocation4]  }
 0x2f8   :  { %694 = dma.done.wait [#allocation4], 128  }
 0x2f9   :  { %695 = vsyncadd [#allocation4], 4294967168 }
 0x2fa   :  { %451 = vsyncpa [#allocation3], 1 }
 0x2fb   :  { %452 = vsyncpa [#allocation6], 1 }
 0x2fc   :  { %453 = vsyncpa [#allocation4], 1 }

</bundles_post_ra>
